<compile_context>
chip_gen: v7x
topology: tpu7x:2x2x1
jax: 0.10.0
libtpu: 0.0.40
codegen_flags: <defaults>
</compile_context>

<pallas_src>
import functools

import jax
import jax.numpy as jnp
from jax.experimental import pallas as pl
from jax.experimental.pallas import tpu as pltpu


def _round_up(x, m):
    return (x + m - 1) // m * m


# ---------------------------------------------------------------------------
# Kernel: one row tile per grid step.
#   o[i*tm:(i+1)*tm, :] = X_tile @ W + b      (f32 MXU accumulation)
# W and b are VMEM-resident (constant index_map), output slab is lane-dense.
# ---------------------------------------------------------------------------
def _proj_kernel(x_ref, w_ref, b_ref, o_ref):
    o_ref[...] = (
        jnp.dot(x_ref[...], w_ref[...], preferred_element_type=jnp.float32)
        + b_ref[...]
    ).astype(o_ref.dtype)


def project_rows_pallas(x, w_pad, b_pad, d_out, *, tm=256):
    """lm = (x @ W + b)[:, :d_out] via a 1-D row-tiled Pallas matmul.

    x:     [N, K]        bf16 activations (valid rows only)
    w_pad: [K_pad, D_pad] bf16, zero-padded once at setup (multiples of 128)
    b_pad: [1, D_pad]     f32
    """
    N, K = x.shape
    K_pad, D_pad = w_pad.shape

    # Row-tile: big enough to feed the MXU, clamped for tiny inputs, always
    # a multiple of 8 (sublane granularity).
    tm = max(8, min(tm, _round_up(N, 8)))
    N_pad = _round_up(N, tm)

    # Pad activations only where strictly necessary (no-op when N and K are
    # already aligned, i.e. the realistic D=512 case).
    if (N_pad, K_pad) != (N, K):
        x = jnp.pad(x, ((0, N_pad - N), (0, K_pad - K)))

    grid = (N_pad // tm,)
    out = pl.pallas_call(
        _proj_kernel,
        grid=grid,
        in_specs=[
            pl.BlockSpec((tm, K_pad), lambda i: (i, 0)),      # X row tile
            pl.BlockSpec((K_pad, D_pad), lambda i: (0, 0)),   # W: VMEM-resident
            pl.BlockSpec((1, D_pad), lambda i: (0, 0)),       # bias
        ],
        out_specs=pl.BlockSpec((tm, D_pad), lambda i: (i, 0)),
        out_shape=jax.ShapeDtypeStruct((N_pad, D_pad), jnp.float32),
        compiler_params=pltpu.CompilerParams(
            dimension_semantics=("parallel",)),
    )(x, w_pad, b_pad)
    return out[:N, :d_out]


# ---------------------------------------------------------------------------
# One-time parameter prep: bf16 cast + feature-dim padding for the projection
# weights (done once, not per forward).
# ---------------------------------------------------------------------------
def prepare_proj_params(proj_w, proj_b):
    K, D = proj_w.shape
    K_pad, D_pad = _round_up(K, 128), _round_up(D, 128)
    w = proj_w.astype(jnp.bfloat16)
    if (K_pad, D_pad) != (K, D):
        w = jnp.pad(w, ((0, K_pad - K), (0, D_pad - D)))
    b = proj_b.reshape(1, -1).astype(jnp.float32)
    if D_pad != D:
        b = jnp.pad(b, ((0, 0), (0, D_pad - D)))
    return w, b, D


# ---------------------------------------------------------------------------
# Jitted forward reproducing UnimolEmbeddingToScoreModel.forward semantics.
# ---------------------------------------------------------------------------
@functools.partial(jax.jit, static_argnames=("d_out",))
def _forward_impl(src_tokens, receptor_x, embed_tokens, w_prep, b_prep, d_out):
    N = receptor_x.shape[0]          # == number of valid (non-pad) tokens
    mask_flat = (src_tokens != 0).reshape(-1)
    # Static-shape compaction (jit-friendly): the receptor carries exactly one
    # row per valid token, so size=N is exact.
    row_idx = jnp.nonzero(mask_flat, size=N, fill_value=0)[0].astype(jnp.int32)
    tok_ids = src_tokens.reshape(-1)[row_idx]
    # bf16 cast fused into the gather -> no f32 [N, D] materialization.
    x_valid = jnp.take(embed_tokens, tok_ids, axis=0).astype(jnp.bfloat16)
    lm = project_rows_pallas(x_valid, w_prep, b_prep, d_out)      # [N, D] f32
    # Contiguous [N, D + Dr] required by the module contract; single XLA fuse.
    return jnp.concatenate([lm, receptor_x.astype(jnp.float32)], axis=-1)


def unimol_embedding_to_score_forward(data, params):
    new_x = _forward_impl(
        data["net_input"]["src_tokens"], data["recptor"]["x"],
        params["embed_tokens"], params["proj_w_prepared"],
        params["proj_b_prepared"], d_out=params["d_model"])
    data["recptor"]["x"] = new_x
    return new_x


# ---------------------------------------------------------------------------
# Example run with small deterministic shapes + pure-JAX reference check.
# ---------------------------------------------------------------------------
if __name__ == "__main__":
    key = jax.random.PRNGKey(0)
    k_emb, k_w, k_b, k_rx = jax.random.split(key, 4)

    B, L = 2, 8          # batch, sequence
    V, D = 16, 32        # vocab, hidden
    Dr = 16              # receptor feature dim

    # src_tokens with explicit padding (0 == pad)
    src_tokens = jnp.array(
        [[3, 5, 7, 2, 0, 0, 0, 0],
         [1, 4, 6, 8, 9, 0, 0, 0]], dtype=jnp.int32)
    n_valid = int((src_tokens != 0).sum())   # 9

    embed_tokens = jax.random.normal(k_emb, (V, D), jnp.float32) * 0.1
    proj_w = jax.random.normal(k_w, (D, D), jnp.float32) * 0.1
    proj_b = jax.random.normal(k_b, (1, D), jnp.float32) * 0.1
    receptor_x = jax.random.normal(k_rx, (n_valid, Dr), jnp.float32)

    w_prep, b_prep, d_model = prepare_proj_params(proj_w, proj_b)
    params = {
        "embed_tokens": embed_tokens,
        "proj_w_prepared": w_prep,
        "proj_b_prepared": b_prep,
        "d_model": d_model,
    }

    data = {
        "net_input": {"src_tokens": src_tokens},
        "recptor": {"x": receptor_x},
    }

    out = unimol_embedding_to_score_forward(data, params)
    out = jax.block_until_ready(out)

    # pure-JAX reference (same bf16 input cast, f32 accumulation)
    emb_all = jnp.take(embed_tokens, src_tokens.reshape(-1), axis=0)
    idx = jnp.nonzero((src_tokens != 0).reshape(-1), size=n_valid)[0]
    x_sel = emb_all[idx].astype(jnp.bfloat16).astype(jnp.float32)
    w_bf = proj_w.astype(jnp.bfloat16).astype(jnp.float32)
    lm_ref = x_sel @ w_bf + proj_b
    expected = jnp.concatenate([lm_ref, receptor_x], axis=-1)

    assert out.shape == (n_valid, D + Dr), out.shape
    assert jnp.allclose(out, expected, atol=1e-4), "mismatch vs reference"
    assert jnp.array_equal(out[:, D:], receptor_x), "receptor passthrough mismatch"

    print("KERNEL_OK")
</pallas_src>

<mosaic_0001>
module attributes {stable_mosaic.version = 11 : i64} {
  func.func private @main(%arg0: i32) attributes {dimension_semantics = [#tpu.dimension_semantics<core_parallel>], iteration_bounds = array<i64: 2>, tpu.core_type = #tpu.core_type<sc_scalar_subcore>, window_params = []} {
    return
  }
}

module attributes {stable_mosaic.version = 11 : i64} {
  func.func private @main(%arg0: i32) attributes {dimension_semantics = [#tpu.dimension_semantics<core_parallel>], iteration_bounds = array<i64: 2>, tpu.core_type = #tpu.core_type<sc_scalar_subcore>, window_params = []} {
    return
  }
}

module attributes {stable_mosaic.version = 11 : i64} {
  func.func @_proj_kernel(%arg0: i32, %arg1: memref<16x128xbf16, #tpu.memory_space<vmem>>, %arg2: memref<128x128xbf16, #tpu.memory_space<vmem>>, %arg3: memref<1x128xf32, #tpu.memory_space<vmem>>, %arg4: memref<16x128xf32, #tpu.memory_space<vmem>>) attributes {dimension_semantics = [#tpu.dimension_semantics<parallel>], iteration_bounds = array<i64: 1>, scalar_prefetch = 0 : i64, scratch_operands = 0 : i64, tpu.core_type = #tpu.core_type<tc>, window_params = [{transform_indices = @transform_0, window_bounds = array<i64: 16, 128>}, {pipeline_mode = #tpu.pipeline_mode<synchronous>, transform_indices = @transform_1, window_bounds = array<i64: 128, 128>}, {pipeline_mode = #tpu.pipeline_mode<synchronous>, transform_indices = @transform_2, window_bounds = array<i64: 1, 128>}, {transform_indices = @transform_3, window_bounds = array<i64: 16, 128>}]} {
    %c0 = arith.constant 0 : index
    %c0_0 = arith.constant 0 : index
    %0 = vector.load %arg1[%c0, %c0_0] : memref<16x128xbf16, #tpu.memory_space<vmem>>, vector<16x128xbf16>
    %c0_1 = arith.constant 0 : index
    %c0_2 = arith.constant 0 : index
    %1 = vector.load %arg2[%c0_1, %c0_2] : memref<128x128xbf16, #tpu.memory_space<vmem>>, vector<128x128xbf16>
    %cst = arith.constant dense<0.000000e+00> : vector<16x128xf32>
    %2 = tpu.matmul %0, %1, %cst {dimension_numbers = #tpu.dot_dimension_numbers<[1], [0], [0], [1], [0, 0, 1, 1], [], []>} : vector<16x128xbf16>, vector<128x128xbf16>, vector<16x128xf32> -> vector<16x128xf32>
    %c0_3 = arith.constant 0 : index
    %c0_4 = arith.constant 0 : index
    %3 = vector.load %arg3[%c0_3, %c0_4] : memref<1x128xf32, #tpu.memory_space<vmem>>, vector<1x128xf32>
    %4 = vector.broadcast %3 : vector<1x128xf32> to vector<16x128xf32>
    %5 = arith.addf %2, %4 : vector<16x128xf32>
    %c0_5 = arith.constant 0 : index
    %c0_6 = arith.constant 0 : index
    %6 = vector.load %arg4[%c0_5, %c0_6] : memref<16x128xf32, #tpu.memory_space<vmem>>, vector<16x128xf32>
    tpu.vector_store %arg4[%c0_5, %c0_6], %5 {strides = array<i32>} : memref<16x128xf32, #tpu.memory_space<vmem>>, vector<16x128xf32>,
    return
  }
  func.func @transform_0(%arg0: i32) -> (i32, i32) {
    %c0_i32 = arith.constant 0 : i32
    %c0_i32_0 = arith.constant 0 : i32
    return %arg0, %c0_i32 : i32, i32
  }
  func.func @transform_1(%arg0: i32) -> (i32, i32) {
    %c0_i32 = arith.constant 0 : i32
    %c0_i32_0 = arith.constant 0 : i32
    %c0_i32_1 = arith.constant 0 : i32
    return %c0_i32, %c0_i32_0 : i32, i32
  }
  func.func @transform_2(%arg0: i32) -> (i32, i32) {
    %c0_i32 = arith.constant 0 : i32
    %c0_i32_0 = arith.constant 0 : i32
    %c0_i32_1 = arith.constant 0 : i32
    return %c0_i32, %c0_i32_0 : i32, i32
  }
  func.func @transform_3(%arg0: i32) -> (i32, i32) {
    %c0_i32 = arith.constant 0 : i32
    %c0_i32_0 = arith.constant 0 : i32
    return %arg0, %c0_i32 : i32, i32
  }
}

</mosaic_0001>

<bundles_post_ra>
// kernel: _forward_impl.1
= control target key start
LH: loop header
LB: loop body
LE: loop exit
PB: predicated region body
PF: predicated region fallthrough
CT: control target
= control target key end

     0   :  { %v191_v0 = vmov 0.0   ;;  %vm192_vm0 = vmmov 0   ;;  %s249_s1 = inlined_call_operand.vmem [shape: bf16[128,128], index: 1, kind: input, shape index: {}]   ;;  %s250_s0 = inlined_call_operand.vmem [shape: bf16[16,128], index: 0, kind: input, shape index: {}]   ;;  %s251_s2 = inlined_call_operand.vmem [shape: f32[1,128], index: 2, kind: input, shape index: {}]   ;;  %s252_s3 = inlined_call_operand.vmem [shape: f32[16,128], index: 3, kind: output, shape index: {}]  }
   0x1   :  { %160 = vmatprep.subr.bf16.mxu0 %v191_v0  ;;  %v182_v1 = vld [vmem:[%s249_s1] sm:$0xff]   ;;  %176 = vmatprep.mubr.msk.bf16.mxu0 %vm192_vm0, %v191_v0  ;;  %v183_v2 = vld [vmem:[%s249_s1 + $0x8] sm:$0xff]   ;;  %v184_v3 = vld [vmem:[%s249_s1 + $0x10] sm:$0xff]  }
   0x2   :  { %161 = vmatpush3.bf16.msra.mxu0 %v182_v1  ;;  %v185_v4 = vld [vmem:[%s249_s1 + $0x18] sm:$0xff]   ;;  %v186_v5 = vld [vmem:[%s249_s1 + $0x20] sm:$0xff]   ;;  %v187_v6 = vld [vmem:[%s249_s1 + $0x28] sm:$0xff]  }
   0x3   :  { %162 = vmatprep.subr.bf16.mxu0 %v191_v0  ;;  %v188_v7 = vld [vmem:[%s249_s1 + $0x30] sm:$0xff]   ;;  %v189_v8 = vld [vmem:[%s249_s1 + $0x38] sm:$0xff]   ;;  %v190_v9 = vld [vmem:[%s250_s0] sm:$0xff]  }
   0x4   :  { %v141_v10 = vld [vmem:[%s251_s2] ss:$0 sm:$0xff] }
   0x6   :  { %163 = vmatpush3.bf16.msra.mxu0 %v183_v2 }
   0x7   :  { %164 = vmatprep.subr.bf16.mxu0 %v191_v0 }
   0xa   :  { %165 = vmatpush3.bf16.msra.mxu0 %v184_v3 }
   0xb   :  { %166 = vmatprep.subr.bf16.mxu0 %v191_v0 }
   0xe   :  { %167 = vmatpush3.bf16.msra.mxu0 %v185_v4 }
   0xf   :  { %168 = vmatprep.subr.bf16.mxu0 %v191_v0 }
  0x12   :  { %169 = vmatpush3.bf16.msra.mxu0 %v186_v5 }
  0x13   :  { %170 = vmatprep.subr.bf16.mxu0 %v191_v0 }
  0x16   :  { %171 = vmatpush3.bf16.msra.mxu0 %v187_v6 }
  0x17   :  { %172 = vmatprep.subr.bf16.mxu0 %v191_v0 }
  0x1a   :  { %173 = vmatpush3.bf16.msra.mxu0 %v188_v7 }
  0x1b   :  { %174 = vmatprep.subr.bf16.mxu0 %v191_v0 }
  0x1e   :  { %175 = vmatpush3.bf16.msra.mxu0 %v189_v8 }
  0x21   :  { %177 = vmatmul.mubr.bf16.vlgmr.msra.gmra.mrb[0].mxu0 %v190_v9 }
  0xf4   :  { %v128_v11 = vpop.f32.mrb[0].mxu0 }
  0xf5   :  { %v129_v12 = vadd.f32 %v141_v10, %v128_v11  ;;  %v178_v13 = vpop.f32.mrb[1].mxu0 }
  0xf6   :  { %v131_v14 = vpop.f32.mrb[2].mxu0 }
  0xf7   :  { %135 = vst [vmem:[%s252_s3] sm:$0xff] %v129_v12  ;;  %v132_v15 = vadd.f32 %v141_v10, %v131_v14  ;;  %v179_v16 = vpop.f32.mrb[3].mxu0 }
  0xf9   :  { %136 = vst [vmem:[%s252_s3 + $0x8] sm:$0xff] %v132_v15 }

</bundles_post_ra>
